<compile_context>
chip_gen: v7x
topology: tpu7x:2x2x1
jax: 0.10.0
libtpu: 0.0.40
codegen_flags: <defaults>
</compile_context>

<pallas_src>
import functools

import jax
import jax.numpy as jnp
from jax import lax
from jax.experimental import pallas as pl
from jax.experimental.pallas import tpu as pltpu

LANES = 128
TILE_ROWS = 1024          # (1024, 128) f32 tile = 512 KiB per input per buffer
NUM_CORES = 2             # leading "parallel" grid axis (exploits both TCs on v7x)


def _loss_sums_kernel(scalar_ref, x_ref, y_ref, out_ref, *, n_total, tile_rows):
    """Accumulates per-lane partial sums into a per-core (8, 128) resident block:
         row 0: pos-weighted BCE-with-logits
         row 1: sigmoid(x) * y
         row 2: sigmoid(x)
         row 3: y
       Padded / out-of-range elements are masked via logical element index < n."""
    c = pl.program_id(0)
    i = pl.program_id(1)

    @pl.when(i == 0)
    def _():
        out_ref[...] = jnp.zeros_like(out_ref)

    # Logical element index of every slot in this tile -> mask for the ragged
    # tail (also zeroes fully out-of-range tiles of the second core / clamped
    # blocks, whatever garbage the padded VMEM region holds).
    row_off = (c * pl.num_programs(1) + i) * tile_rows
    rows = lax.broadcasted_iota(jnp.int32, (tile_rows, LANES), 0) + row_off
    lanes = lax.broadcasted_iota(jnp.int32, (tile_rows, LANES), 1)
    valid = (rows * LANES + lanes) < n_total

    pos_w = scalar_ref[0]                                   # SMEM scalar pos_weight
    x = jnp.where(valid, x_ref[...].astype(jnp.float32), 0.0)
    y = jnp.where(valid, y_ref[...].astype(jnp.float32), 0.0)

    # numerically stable log-sigmoid pieces (EUP exp/log), shared by BCE and p
    softplus = jnp.log1p(jnp.exp(-jnp.abs(x)))
    log_sig = jnp.minimum(x, 0.0) - softplus                # log sigmoid(x)
    log_1msig = jnp.minimum(-x, 0.0) - softplus             # log(1 - sigmoid(x))

    bce = jnp.where(valid, -(pos_w * y * log_sig + (1.0 - y) * log_1msig), 0.0)
    p = jnp.where(valid, jnp.exp(log_sig), 0.0)             # sigmoid(x), reuses log_sig

    out_ref[0, :] += jnp.sum(bce, axis=0)
    out_ref[1, :] += jnp.sum(p * y, axis=0)
    out_ref[2, :] += jnp.sum(p, axis=0)
    out_ref[3, :] += jnp.sum(y, axis=0)


def _loss_sums(pred, gt, pos_weight):
    """Runs the Pallas reduction; returns (bce_sum, inter, p_sum, y_sum, n_valid)."""
    x = pred.reshape(-1)
    y = gt.reshape(-1)
    n = x.shape[0]

    # Tail-pad only when the element count isn't lane-aligned (rare, tiny copy).
    if n % LANES:
        pad = LANES - n % LANES
        x = jnp.pad(x, (0, pad))
        y = jnp.pad(y, (0, pad))
    rows = x.shape[0] // LANES
    X = x.reshape(rows, LANES)       # contiguous reshape: no full-size copy
    Y = y.reshape(rows, LANES)

    tile_rows = min(TILE_ROWS, rows)             # block never exceeds the array
    tiles = pl.cdiv(rows, tile_rows)
    cores = min(NUM_CORES, tiles)
    steps = pl.cdiv(tiles, cores)

    def in_map(c, i, s):
        # clamp so the last core's extra steps stay in-bounds (they are fully
        # masked in-kernel anyway)
        return (jnp.minimum(c * steps + i, tiles - 1), 0)

    scalars = jnp.asarray(pos_weight, jnp.float32).reshape(1)
    kernel = functools.partial(_loss_sums_kernel, n_total=n, tile_rows=tile_rows)

    out = pl.pallas_call(
        kernel,
        out_shape=jax.ShapeDtypeStruct((cores, 8, LANES), jnp.float32),
        grid_spec=pltpu.PrefetchScalarGridSpec(
            num_scalar_prefetch=1,
            grid=(cores, steps),
            in_specs=[pl.BlockSpec((tile_rows, LANES), in_map),
                      pl.BlockSpec((tile_rows, LANES), in_map)],
            out_specs=pl.BlockSpec((None, 8, LANES), lambda c, i, s: (c, 0, 0)),
        ),
        compiler_params=pltpu.CompilerParams(
            dimension_semantics=("parallel", "arbitrary"),
            vmem_limit_bytes=32 * 1024 * 1024),
    )(scalars, X, Y)

    sums = out.sum(axis=(0, 2))      # tiny (cores, 8, 128) -> (8,) glue reduce
    return sums[0], sums[1], sums[2], sums[3], jnp.float32(n)


@jax.jit
def _total_loss_value(pred, gt, pos_weight, sched_val):
    eps = jnp.float32(1e-6)
    bce_sum, inter, p_sum, y_sum, n_valid = _loss_sums(pred, gt, pos_weight)
    dsl = bce_sum / n_valid                                   # DSL: weighted BCE (mean)
    tea = 1.0 - (2.0 * inter + eps) / (p_sum + y_sum + eps)   # TEA: soft Dice loss
    return dsl + sched_val * tea


class LossScheduler:
    def __init__(self, max_epoch):
        self.max_epoch = max_epoch
        self.val = 0.0

    def update_by_epoch(self, epoch):
        denom = max(1, self.max_epoch - 1)
        self.val = float(min(1.0, max(0.0, epoch / denom)))

    def get_val(self):
        return self.val


class DSLState:
    """Dynamic class-weight state derived from the 'train_dataloader' stats."""

    def __init__(self, train_dataloader, max_epoch):
        pos = 0.0
        tot = 0.0
        for g in train_dataloader:
            pos += float(jnp.sum(g))
            tot += float(g.size)
        self.base_pos_weight = (tot - pos) / max(pos, 1.0)
        self.max_epoch = max_epoch
        self.epoch = 0

    def step(self, epoch):
        self.epoch = epoch

    def pos_weight(self):
        t = self.epoch / max(1, self.max_epoch - 1)
        return 1.0 + (self.base_pos_weight - 1.0) * float(min(1.0, max(0.0, t)))


class TotalLoss:
    """JAX/Pallas port of DCL.total_loss."""

    def __init__(self, train_dataloader, max_epoch):
        self.dsl = DSLState(train_dataloader, max_epoch)
        self.scheduler = LossScheduler(max_epoch)

    def step(self, epoch):
        self.dsl.step(epoch)
        self.scheduler.update_by_epoch(epoch)

    def __call__(self, pred, gt):
        pos_w = jnp.float32(self.dsl.pos_weight())
        sched = jnp.float32(self.scheduler.get_val())
        return _total_loss_value(pred, gt, pos_w, sched)


if __name__ == "__main__":
    key = jax.random.PRNGKey(0)
    k1, k2, k3 = jax.random.split(key, 3)

    B, C, H, W = 2, 1, 16, 16  # NCHW, binary segmentation logits / labels
    pred = jax.random.normal(k1, (B, C, H, W), dtype=jnp.float32)
    gt = (jax.random.uniform(k2, (B, C, H, W)) > 0.7).astype(jnp.float32)

    # synthetic "train_dataloader": a few ground-truth batches for class stats
    train_dataloader = [
        (jax.random.uniform(jax.random.fold_in(k3, i), (B, C, H, W)) > 0.7).astype(jnp.float32)
        for i in range(3)
    ]

    max_epoch = 10
    loss_fn = TotalLoss(train_dataloader, max_epoch)
    loss_fn.step(epoch=3)  # call at start of epoch, as in the reference module

    val = loss_fn(pred, gt)
    jax.block_until_ready(val)
    assert val.shape == () and jnp.isfinite(val)
    print("KERNEL_OK")
</pallas_src>

<mosaic_0001>
module attributes {stable_mosaic.version = 11 : i64} {
  func.func @_loss_sums_kernel(%arg0: i32, %arg1: i32, %arg2: memref<1xf32, #tpu.memory_space<smem>>, %arg3: memref<4x128xf32, #tpu.memory_space<vmem>>, %arg4: memref<4x128xf32, #tpu.memory_space<vmem>>, %arg5: memref<1x8x128xf32, #tpu.memory_space<vmem>>) attributes {dimension_semantics = [#tpu.dimension_semantics<parallel>, #tpu.dimension_semantics<arbitrary>], iteration_bounds = array<i64: 1, 1>, scalar_prefetch = 1 : i64, scratch_operands = 0 : i64, tpu.core_type = #tpu.core_type<tc>, window_params = [{transform_indices = @transform_0, window_bounds = array<i64: 4, 128>}, {transform_indices = @transform_1, window_bounds = array<i64: 4, 128>}, {transform_indices = @transform_2, window_bounds = array<i64: 1, 8, 128>}]} {
    %c0_i32 = arith.constant 0 : i32
    %0 = arith.cmpi eq, %arg1, %c0_i32 : i32
    %1 = arith.extui %0 : i1 to i32
    %c0_i32_0 = arith.constant 0 : i32
    %2 = arith.cmpi ne, %1, %c0_i32_0 : i32
    scf.if %2 {
      %cst_39 = arith.constant 0.000000e+00 : f32
      %78 = vector.broadcast %cst_39 : f32 to vector<8x128xf32>
      %c0_40 = arith.constant 0 : index
      %c0_41 = arith.constant 0 : index
      %c0_42 = arith.constant 0 : index
      %79 = vector.load %arg5[%c0_40, %c0_41, %c0_42] : memref<1x8x128xf32, #tpu.memory_space<vmem>>, vector<1x8x128xf32>
      %80 = vector.shape_cast %79 : vector<1x8x128xf32> to vector<8x128xf32>
      %81 = vector.shape_cast %78 : vector<8x128xf32> to vector<1x8x128xf32>
      tpu.vector_store %arg5[%c0_40, %c0_41, %c0_42], %81 {strides = array<i32>} : memref<1x8x128xf32, #tpu.memory_space<vmem>>, vector<1x8x128xf32>,
    } else {
    }
    %c1_i32 = arith.constant 1 : i32
    %3 = arith.muli %arg0, %c1_i32 : i32
    %4 = arith.addi %3, %arg1 : i32
    %c4_i32 = arith.constant 4 : i32
    %5 = arith.muli %4, %c4_i32 : i32
    %6 = tpu.iota {dimensions = array<i32: 0>} : vector<4x128xi32>
    %7 = vector.broadcast %5 : i32 to vector<4x128xi32>
    %8 = arith.addi %6, %7 : vector<4x128xi32>
    %9 = tpu.iota {dimensions = array<i32: 1>} : vector<4x128xi32>
    %c128_i32 = arith.constant 128 : i32
    %10 = vector.broadcast %c128_i32 : i32 to vector<4x128xi32>
    %11 = arith.muli %8, %10 : vector<4x128xi32>
    %12 = arith.addi %11, %9 : vector<4x128xi32>
    %c512_i32 = arith.constant 512 : i32
    %13 = vector.broadcast %c512_i32 : i32 to vector<4x128xi32>
    %14 = arith.cmpi slt, %12, %13 : vector<4x128xi32>
    %c0 = arith.constant 0 : index
    %15 = memref.load %arg2[%c0] : memref<1xf32, #tpu.memory_space<smem>>
    %c0_1 = arith.constant 0 : index
    %c0_2 = arith.constant 0 : index
    %16 = vector.load %arg3[%c0_1, %c0_2] : memref<4x128xf32, #tpu.memory_space<vmem>>, vector<4x128xf32>
    %cst = arith.constant 0.000000e+00 : f32
    %17 = vector.broadcast %cst : f32 to vector<4x128xf32>
    %18 = arith.select %14, %16, %17 : vector<4x128xi1>, vector<4x128xf32>
    %c0_3 = arith.constant 0 : index
    %c0_4 = arith.constant 0 : index
    %19 = vector.load %arg4[%c0_3, %c0_4] : memref<4x128xf32, #tpu.memory_space<vmem>>, vector<4x128xf32>
    %cst_5 = arith.constant 0.000000e+00 : f32
    %20 = vector.broadcast %cst_5 : f32 to vector<4x128xf32>
    %21 = arith.select %14, %19, %20 : vector<4x128xi1>, vector<4x128xf32>
    %22 = math.absf %18 : vector<4x128xf32>
    %cst_6 = arith.constant 0.000000e+00 : f32
    %23 = vector.broadcast %cst_6 : f32 to vector<4x128xf32>
    %24 = arith.subf %23, %22 : vector<4x128xf32>
    %25 = math.exp %24 : vector<4x128xf32>
    %26 = math.log1p %25 : vector<4x128xf32>
    %cst_7 = arith.constant 0.000000e+00 : f32
    %27 = vector.broadcast %cst_7 : f32 to vector<4x128xf32>
    %28 = arith.minimumf %18, %27 : vector<4x128xf32>
    %29 = arith.subf %28, %26 : vector<4x128xf32>
    %cst_8 = arith.constant 0.000000e+00 : f32
    %30 = vector.broadcast %cst_8 : f32 to vector<4x128xf32>
    %31 = arith.subf %30, %18 : vector<4x128xf32>
    %cst_9 = arith.constant 0.000000e+00 : f32
    %32 = vector.broadcast %cst_9 : f32 to vector<4x128xf32>
    %33 = arith.minimumf %31, %32 : vector<4x128xf32>
    %34 = arith.subf %33, %26 : vector<4x128xf32>
    %35 = vector.broadcast %15 : f32 to vector<4x128xf32>
    %36 = arith.mulf %35, %21 : vector<4x128xf32>
    %37 = arith.mulf %36, %29 : vector<4x128xf32>
    %cst_10 = arith.constant 1.000000e+00 : f32
    %38 = vector.broadcast %cst_10 : f32 to vector<4x128xf32>
    %39 = arith.subf %38, %21 : vector<4x128xf32>
    %40 = arith.mulf %39, %34 : vector<4x128xf32>
    %41 = arith.addf %37, %40 : vector<4x128xf32>
    %cst_11 = arith.constant 0.000000e+00 : f32
    %42 = vector.broadcast %cst_11 : f32 to vector<4x128xf32>
    %43 = arith.subf %42, %41 : vector<4x128xf32>
    %cst_12 = arith.constant 0.000000e+00 : f32
    %44 = vector.broadcast %cst_12 : f32 to vector<4x128xf32>
    %45 = arith.select %14, %43, %44 : vector<4x128xi1>, vector<4x128xf32>
    %46 = math.exp %29 : vector<4x128xf32>
    %cst_13 = arith.constant 0.000000e+00 : f32
    %47 = vector.broadcast %cst_13 : f32 to vector<4x128xf32>
    %48 = arith.select %14, %46, %47 : vector<4x128xi1>, vector<4x128xf32>
    %c0_14 = arith.constant 0 : index
    %c0_15 = arith.constant 0 : index
    %c0_16 = arith.constant 0 : index
    %49 = vector.load %arg5[%c0_14, %c0_15, %c0_16] : memref<1x8x128xf32, #tpu.memory_space<vmem>>, vector<1x1x128xf32>
    %50 = vector.shape_cast %49 : vector<1x1x128xf32> to vector<128xf32>
    %cst_17 = arith.constant dense<0.000000e+00> : vector<128xf32>
    %51 = vector.multi_reduction <add>, %45, %cst_17 [0] : vector<4x128xf32> to vector<128xf32>
    %52 = arith.addf %50, %51 : vector<128xf32>
    %c0_18 = arith.constant 0 : index
    %c0_19 = arith.constant 0 : index
    %c0_20 = arith.constant 0 : index
    %53 = vector.load %arg5[%c0_18, %c0_19, %c0_20] : memref<1x8x128xf32, #tpu.memory_space<vmem>>, vector<1x1x128xf32>
    %54 = vector.shape_cast %53 : vector<1x1x128xf32> to vector<128xf32>
    %55 = vector.shape_cast %52 : vector<128xf32> to vector<1x1x128xf32>
    tpu.vector_store %arg5[%c0_18, %c0_19, %c0_20], %55 {strides = array<i32>} : memref<1x8x128xf32, #tpu.memory_space<vmem>>, vector<1x1x128xf32>,
    %c0_21 = arith.constant 0 : index
    %c1 = arith.constant 1 : index
    %c0_22 = arith.constant 0 : index
    %56 = vector.load %arg5[%c0_21, %c1, %c0_22] : memref<1x8x128xf32, #tpu.memory_space<vmem>>, vector<1x1x128xf32>
    %57 = vector.shape_cast %56 : vector<1x1x128xf32> to vector<128xf32>
    %58 = arith.mulf %48, %21 : vector<4x128xf32>
    %cst_23 = arith.constant dense<0.000000e+00> : vector<128xf32>
    %59 = vector.multi_reduction <add>, %58, %cst_23 [0] : vector<4x128xf32> to vector<128xf32>
    %60 = arith.addf %57, %59 : vector<128xf32>
    %c0_24 = arith.constant 0 : index
    %c1_25 = arith.constant 1 : index
    %c0_26 = arith.constant 0 : index
    %61 = vector.load %arg5[%c0_24, %c1_25, %c0_26] : memref<1x8x128xf32, #tpu.memory_space<vmem>>, vector<1x1x128xf32>
    %62 = vector.shape_cast %61 : vector<1x1x128xf32> to vector<128xf32>
    %63 = vector.shape_cast %60 : vector<128xf32> to vector<1x1x128xf32>
    tpu.vector_store %arg5[%c0_24, %c1_25, %c0_26], %63 {strides = array<i32>} : memref<1x8x128xf32, #tpu.memory_space<vmem>>, vector<1x1x128xf32>,
    %c0_27 = arith.constant 0 : index
    %c2 = arith.constant 2 : index
    %c0_28 = arith.constant 0 : index
    %64 = vector.load %arg5[%c0_27, %c2, %c0_28] : memref<1x8x128xf32, #tpu.memory_space<vmem>>, vector<1x1x128xf32>
    %65 = vector.shape_cast %64 : vector<1x1x128xf32> to vector<128xf32>
    %cst_29 = arith.constant dense<0.000000e+00> : vector<128xf32>
    %66 = vector.multi_reduction <add>, %48, %cst_29 [0] : vector<4x128xf32> to vector<128xf32>
    %67 = arith.addf %65, %66 : vector<128xf32>
    %c0_30 = arith.constant 0 : index
    %c2_31 = arith.constant 2 : index
    %c0_32 = arith.constant 0 : index
    %68 = vector.load %arg5[%c0_30, %c2_31, %c0_32] : memref<1x8x128xf32, #tpu.memory_space<vmem>>, vector<1x1x128xf32>
    %69 = vector.shape_cast %68 : vector<1x1x128xf32> to vector<128xf32>
    %70 = vector.shape_cast %67 : vector<128xf32> to vector<1x1x128xf32>
    tpu.vector_store %arg5[%c0_30, %c2_31, %c0_32], %70 {strides = array<i32>} : memref<1x8x128xf32, #tpu.memory_space<vmem>>, vector<1x1x128xf32>,
    %c0_33 = arith.constant 0 : index
    %c3 = arith.constant 3 : index
    %c0_34 = arith.constant 0 : index
    %71 = vector.load %arg5[%c0_33, %c3, %c0_34] : memref<1x8x128xf32, #tpu.memory_space<vmem>>, vector<1x1x128xf32>
    %72 = vector.shape_cast %71 : vector<1x1x128xf32> to vector<128xf32>
    %cst_35 = arith.constant dense<0.000000e+00> : vector<128xf32>
    %73 = vector.multi_reduction <add>, %21, %cst_35 [0] : vector<4x128xf32> to vector<128xf32>
    %74 = arith.addf %72, %73 : vector<128xf32>
    %c0_36 = arith.constant 0 : index
    %c3_37 = arith.constant 3 : index
    %c0_38 = arith.constant 0 : index
    %75 = vector.load %arg5[%c0_36, %c3_37, %c0_38] : memref<1x8x128xf32, #tpu.memory_space<vmem>>, vector<1x1x128xf32>
    %76 = vector.shape_cast %75 : vector<1x1x128xf32> to vector<128xf32>
    %77 = vector.shape_cast %74 : vector<128xf32> to vector<1x1x128xf32>
    tpu.vector_store %arg5[%c0_36, %c3_37, %c0_38], %77 {strides = array<i32>} : memref<1x8x128xf32, #tpu.memory_space<vmem>>, vector<1x1x128xf32>,
    return
  }
  func.func @transform_0(%arg0: i32, %arg1: i32, %arg2: memref<1xf32, #tpu.memory_space<smem>>) -> (i32, i32) {
    %c1_i32 = arith.constant 1 : i32
    %0 = arith.muli %arg0, %c1_i32 : i32
    %1 = arith.addi %0, %arg1 : i32
    %c0_i32 = arith.constant 0 : i32
    %2 = arith.minsi %1, %c0_i32 : i32
    %c0_i32_0 = arith.constant 0 : i32
    %c0_i32_1 = arith.constant 0 : i32
    return %2, %c0_i32_0 : i32, i32
  }
  func.func @transform_1(%arg0: i32, %arg1: i32, %arg2: memref<1xf32, #tpu.memory_space<smem>>) -> (i32, i32) {
    %c1_i32 = arith.constant 1 : i32
    %0 = arith.muli %arg0, %c1_i32 : i32
    %1 = arith.addi %0, %arg1 : i32
    %c0_i32 = arith.constant 0 : i32
    %2 = arith.minsi %1, %c0_i32 : i32
    %c0_i32_0 = arith.constant 0 : i32
    %c0_i32_1 = arith.constant 0 : i32
    return %2, %c0_i32_0 : i32, i32
  }
  func.func @transform_2(%arg0: i32, %arg1: i32, %arg2: memref<1xf32, #tpu.memory_space<smem>>) -> (i32, i32, i32) {
    %c0_i32 = arith.constant 0 : i32
    %c0_i32_0 = arith.constant 0 : i32
    %c0_i32_1 = arith.constant 0 : i32
    return %arg0, %c0_i32, %c0_i32_0 : i32, i32, i32
  }
}

</mosaic_0001>

<bundles_post_ra>
// kernel: _total_loss_value.1
= control target key start
LH: loop header
LB: loop body
LE: loop exit
PB: predicated region body
PF: predicated region fallthrough
CT: control target
= control target key end

     0   :  { %v74_v0 = vlaneseq  ;;  %v182_v1 = vmov 0.0   ;;  %vm118_vm1 = vcmask 1043456   ;;  %s247_s3 = inlined_call_operand.vmem [shape: f32[1,8,128], index: 3, kind: output, shape index: {}]   ;;  %s248_s1 = inlined_call_operand.vmem [shape: f32[4,128], index: 1, kind: input, shape index: {}]   ;;  %s249_s2 = inlined_call_operand.vmem [shape: f32[4,128], index: 2, kind: input, shape index: {}]   ;;  %s250_s0 = inlined_call_operand.<no memory space> [shape: f32[1], index: 0, kind: input, shape index: {}]  }
   0x1   :  { %71 = vst [vmem:[%s247_s3] sm:$0xff] %v182_v1  ;;  %v84_v6 = vld [vmem:[%s248_s1] sm:$0xf]  ;;  %v106_v29 = vstv %s250_s0 }
   0x2   :  { %v75_v2 = vshrl.u32 %v74_v0, 7  ;;  %v79_v3 = vand.u32 127, %v74_v0  ;;  %v86_v7 = vld [vmem:[%s249_s2] sm:$0xf] }
   0x4   :  { %v80_v4 = vmul.u32 128, %v75_v2 }
   0x6   :  { %v81_v5 = vadd.s32 %v80_v4, %v79_v3 }
   0x8   :  { %vm82_vm0 = vcmp.lt.s32.totalorder %v81_v5, 512  ;;  %v149_v19 = vld [vmem:[%s247_s3 + $0x3] sm:$0x1]  ;;  %v117_v57 = vld [vmem:[%s247_s3] sm:$0x1] }
   0x9   :  { %v85_v8 = vsel %vm82_vm0, %v84_v6, 0.0  ;;  %v87_v9 = vsel %vm82_vm0, %v86_v7, 0.0  ;;  %v139_v4 = vld [vmem:[%s247_s3 + $0x2] sm:$0x1]  ;;  %v128_v7 = vld [vmem:[%s247_s3 + $0x1] sm:$0x1] }
   0xa   :  { %v88_v10 = vand.u32 2147483647, %v85_v8  ;;  %v150_v11 = vsel %vm118_vm1, %v87_v9, 0.0  ;;  %v103_v27 = vsub.f32 0.0, %v85_v8  ;;  %v101_v31 = vmin.f32 %v85_v8, 0.0 }
   0xb   :  { %v151_v13 = vrot.slane %v150_v11, 4  ;;  %v107_v34 = vmul.f32 %v106_v29, %v87_v9  ;;  %v109_v35 = vsub.f32 1.0, %v87_v9 }
   0xc   :  { %v89_v12 = vsub.f32 0.0, %v88_v10  ;;  %v104_v32 = vmin.f32 %v103_v27, 0.0 }
   0xd   :  { %v152_v15 = vadd.f32 %v151_v13, %v150_v11 }
   0xe   :  { %v90_v14 = vmul.f32 1.442695, %v89_v12 }
   0xf   :  { %v153_v16 = vrot.slane %v152_v15, 2 }
  0x10   :  { %176 = vpow2.f32 %v90_v14 }
  0x11   :  { %v154_v17 = vadd.f32 %v153_v16, %v152_v15 }
  0x13   :  { %v155_v18 = vrot.slane %v154_v17, 1 }
  0x15   :  { %v156_v20 = vadd.f32 %v155_v18, %v154_v17 }
  0x17   :  { %v157_v21 = vadd.f32 %v156_v20, %v149_v19 }
  0x19   :  { %158 = vst [vmem:[%s247_s3 + $0x3] sm:$0x1] %v157_v21 }
  0x1a   :  { %v177_v22 = vpop.eup %176 }
  0x1b   :  { %v92_v23 = vadd.f32 1.0, %v177_v22  ;;  %v95_v24 = vmul.f32 -0.5, %v177_v22  ;;  %v98_v26 = vand.u32 2147483647, %v177_v22 }
  0x1d   :  { %178 = vlog2.f32 %v92_v23  ;;  %v96_v25 = vadd.f32 1.0, %v95_v24  ;;  %vm99_vm2 = vcmp.lt.f32.partialorder %v98_v26, 0.0004427343 }
  0x1f   :  { %v97_v28 = vmul.f32 %v177_v22, %v96_v25 }
  0x27   :  { %v179_v30 = vpop.eup %178 }
  0x28   :  { %v94_v33 = vmul.f32 0.6931472, %v179_v30 }
  0x2a   :  { %v100_v36 = vsel %vm99_vm2, %v97_v28, %v94_v33 }
  0x2b   :  { %v102_v37 = vsub.f32 %v101_v31, %v100_v36  ;;  %v105_v38 = vsub.f32 %v104_v32, %v100_v36 }
  0x2d   :  { %v108_v39 = vmul.f32 %v107_v34, %v102_v37  ;;  %v110_v40 = vmul.f32 %v109_v35, %v105_v38  ;;  %v114_v41 = vmul.f32 1.442695, %v102_v37 }
  0x2f   :  { %v111_v42 = vadd.f32 %v110_v40, %v108_v39  ;;  %180 = vpow2.f32 %v114_v41 }
  0x31   :  { %v112_v43 = vsub.f32 0.0, %v111_v42 }
  0x33   :  { %v113_v44 = vsel %vm82_vm0, %v112_v43, 0.0 }
  0x34   :  { %v119_v45 = vsel %vm118_vm1, %v113_v44, 0.0 }
  0x35   :  { %v120_v46 = vrot.slane %v119_v45, 4 }
  0x37   :  { %v121_v47 = vadd.f32 %v120_v46, %v119_v45 }
  0x39   :  { %v181_v48 = vpop.eup %180  ;;  %v122_v49 = vrot.slane %v121_v47, 2 }
  0x3a   :  { %v116_v50 = vsel %vm82_vm0, %v181_v48, 0.0 }
  0x3b   :  { %v123_v51 = vadd.f32 %v122_v49, %v121_v47  ;;  %v129_v52 = vmul.f32 %v116_v50, %v87_v9  ;;  %v140_v53 = vsel %vm118_vm1, %v116_v50, 0.0 }
  0x3c   :  { %v141_v54 = vrot.slane %v140_v53, 4 }
  0x3d   :  { %v124_v55 = vrot.slane %v123_v51, 1  ;;  %v130_v56 = vsel %vm118_vm1, %v129_v52, 0.0 }
  0x3e   :  { %v131_v58 = vrot.slane %v130_v56, 4  ;;  %v142_v59 = vadd.f32 %v141_v54, %v140_v53 }
  0x3f   :  { %v125_v60 = vadd.f32 %v124_v55, %v123_v51 }
  0x40   :  { %v132_v61 = vadd.f32 %v131_v58, %v130_v56  ;;  %v143_v62 = vrot.slane %v142_v59, 2 }
  0x41   :  { %v126_v63 = vadd.f32 %v125_v60, %v117_v57 }
  0x42   :  { %v133_v0 = vrot.slane %v132_v61, 2  ;;  %v144_v1 = vadd.f32 %v143_v62, %v142_v59 }
  0x43   :  { %127 = vst [vmem:[%s247_s3] sm:$0x1] %v126_v63 }
  0x44   :  { %v134_v2 = vadd.f32 %v133_v0, %v132_v61  ;;  %v145_v3 = vrot.slane %v144_v1, 1 }
  0x46   :  { %v135_v5 = vrot.slane %v134_v2, 1  ;;  %v146_v6 = vadd.f32 %v145_v3, %v144_v1 }
  0x48   :  { %v136_v8 = vadd.f32 %v135_v5, %v134_v2  ;;  %v147_v9 = vadd.f32 %v146_v6, %v139_v4 }
  0x4a   :  { %v137_v10 = vadd.f32 %v136_v8, %v128_v7  ;;  %148 = vst [vmem:[%s247_s3 + $0x2] sm:$0x1] %v147_v9 }
  0x4c   :  { %138 = vst [vmem:[%s247_s3 + $0x1] sm:$0x1] %v137_v10 }

</bundles_post_ra>
